<compile_context>
chip_gen: v5e
topology: v5e:2x2
jax: 0.10.0
libtpu: 0.0.40
codegen_flags: <defaults>
</compile_context>

<pallas_src>
import functools

import jax
import jax.numpy as jnp
from jax import lax
from jax.experimental import pallas as pl
from jax.experimental.pallas import tpu as pltpu


_PARTIAL_SUBLANES = 8
_PARTIAL_LANES = 128
_LANE = 128


def _round_up(x, m):
    return (x + m - 1) // m * m


def _round_down(x, m):
    return (x // m) * m


def _default_num_splits():
    # 2 TensorCores per chip on v7x; 1 on v5e/v6e.
    try:
        kind = jax.devices()[0].device_kind.lower()
        if "v7" in kind or "7x" in kind:
            return 2
    except Exception:
        pass
    return 1


def _galaxy_zoo_mse_kernel(pred_ref, targ_ref, w_ref, partial_ref, acc_ref, *,
                           tiles_per_split, tm, valid_rows, need_mask):
    """One (tm, N) batch tile: acc[1,N] += w[1,tm] @ (pred - targ)^2 [tm,N]."""
    i = pl.program_id(1)                       # reduction ("arbitrary") axis

    @pl.when(i == 0)
    def _():
        acc_ref[...] = jnp.zeros_like(acc_ref)

    # Upcast in-kernel so inputs can stay bf16/f16 in HBM (halves DMA bytes).
    diff = pred_ref[...].astype(jnp.float32) - targ_ref[...].astype(jnp.float32)
    if need_mask:
        # Ragged / over-covered trailing tile: rows past the batch end hold
        # undefined data -> zero them before squaring (select kills NaN/Inf).
        base = (pl.program_id(0) * tiles_per_split + i) * tm
        row = base + lax.broadcasted_iota(jnp.int32, (tm, 1), 0)
        diff = jnp.where(row < valid_rows, diff, 0.0)
    sq = diff * diff                           # [tm, N] f32 (VPU)

    # Row reduction + per-row weight fused as an MXU contraction (MXU is
    # otherwise idle): [1, tm] @ [tm, N] -> [1, N].
    w = w_ref[0]                               # [1, tm] f32, lane-major
    acc_ref[...] += lax.dot_general(
        w, sq, dimension_numbers=(((1,), (0,)), ((), ())),
        preferred_element_type=jnp.float32)

    @pl.when(i == pl.num_programs(1) - 1)
    def _():
        # One cross-lane reduce per *split* (not per step); broadcast the
        # scalar into a lane-aligned (8, 128) output tile (unmasked store).
        partial_ref[...] = jnp.full(
            (_PARTIAL_SUBLANES, _PARTIAL_LANES), jnp.sum(acc_ref[...]),
            jnp.float32)


def galaxy_zoo_loss(predictions, targets, vote_counts=None,
                    vote_weight=1.0, consistency_weight=0.1,
                    block_rows=None, num_splits=None):
    """JAX/Pallas equivalent of GalaxyZooLoss.forward."""
    B, N = predictions.shape
    itemsize = jnp.dtype(predictions.dtype).itemsize

    # ---- tiny O(B) JAX prologue: hoisted global max / normalization --------
    if vote_counts is None:
        w_flat = jnp.ones((B,), jnp.float32)
    else:
        vc = jnp.reshape(vote_counts, (B,)).astype(jnp.float32)
        # TODO(synk): max(vote_counts)==0 divides by zero, same as the PyTorch
        # reference (NaN/Inf propagates identically).
        w_flat = vc / jnp.max(vc)

    # ---- row-tile size ------------------------------------------------------
    # Sublane packing granularity: 8 rows (32-bit), 16 (16-bit), 32 (8-bit).
    align = {4: 8, 2: 16, 1: 32}.get(itemsize, 8)

    preds, targs = predictions, targets
    if B < align:
        # Tiny batch: pad the (tiny) arrays up to one packed tile; zero rows
        # contribute nothing (diff == 0, weight == 0).
        pad = align - B
        preds = jnp.pad(preds, ((0, pad), (0, 0)))
        targs = jnp.pad(targs, ((0, pad), (0, 0)))
        w_flat = jnp.pad(w_flat, (0, pad))
        b_rows = align
    else:
        b_rows = B

    if block_rows is None:
        block_rows = 16384 if itemsize <= 2 else 8192
    # Cap tm so the double-buffered footprint stays <= ~40 MiB (v7x: 64 MiB/TC).
    bytes_per_row = 2 * (2 * _LANE * itemsize + 32)     # 2 bufs x (pred+targ+w)
    max_tm = max(align, _round_down((40 << 20) // bytes_per_row, align))
    tm = min(int(block_rows), b_rows, max_tm)
    tm = max(align, _round_down(tm, align))             # aligned, tm <= b_rows

    total_tiles = pl.cdiv(b_rows, tm)
    ns = num_splits if num_splits is not None else _default_num_splits()
    ns = max(1, min(int(ns), total_tiles))
    tiles_per_split = pl.cdiv(total_tiles, ns)
    num_row_tiles = ns * tiles_per_split
    covered_rows = num_row_tiles * tm
    need_mask = covered_rows != b_rows       # ragged / over-covered tail tile

    # Lane-major per-row weights, zero-padded to the covered rows (tiny copy).
    w_tiles = jnp.pad(w_flat, (0, covered_rows - b_rows)).reshape(
        num_row_tiles, 1, tm)

    # ---- VMEM budget (lane-padded) ------------------------------------------
    footprint = (2 * 2 * tm * _round_up(N, _LANE) * itemsize   # pred+targ, 2 bufs
                 + 2 * 8 * tm * 4                              # weights, 2 bufs
                 + (2 << 20))                                  # acc/out headroom
    vmem_limit = int(min(max(32 << 20, footprint + (12 << 20)), 56 << 20))

    last_tile = total_tiles - 1

    def row_block(s, i):
        t = s * tiles_per_split + i
        if num_row_tiles > total_tiles:
            # Over-covered tiles (uneven split): clamp to the last real tile so
            # the DMA stays in-bounds; the in-kernel mask zeros their rows.
            t = jnp.minimum(t, last_tile)
        return (t, 0)

    def w_block(s, i):
        return (s * tiles_per_split + i, 0, 0)

    kernel = functools.partial(
        _galaxy_zoo_mse_kernel,
        tiles_per_split=tiles_per_split, tm=tm,
        valid_rows=b_rows, need_mask=need_mask)

    partials = pl.pallas_call(
        kernel,
        out_shape=jax.ShapeDtypeStruct(
            (ns * _PARTIAL_SUBLANES, _PARTIAL_LANES), jnp.float32),
        grid_spec=pltpu.PrefetchScalarGridSpec(
            num_scalar_prefetch=0,
            grid=(ns, tiles_per_split),
            in_specs=[
                pl.BlockSpec((tm, N), row_block),        # predictions (native dtype)
                pl.BlockSpec((tm, N), row_block),        # targets     (native dtype)
                pl.BlockSpec((1, 1, tm), w_block),       # lane-major weights (f32)
            ],
            out_specs=pl.BlockSpec((_PARTIAL_SUBLANES, _PARTIAL_LANES),
                                   lambda s, i: (s, 0)),
            scratch_shapes=[pltpu.VMEM((1, N), jnp.float32)],
        ),
        compiler_params=pltpu.CompilerParams(
            # split axis parallel (2 TCs on v7x), reduction axis arbitrary
            dimension_semantics=("parallel", "arbitrary"),
            vmem_limit_bytes=vmem_limit),
    )(preds, targs, w_tiles)

    # One scalar per split sits at element [0, 0] of its (8, 128) tile.
    partial_sums = partials[0::_PARTIAL_SUBLANES, 0]
    mse = jnp.sum(partial_sums) / jnp.float32(B * N)   # mean over ORIGINAL B*N

    consistency_loss = jnp.float32(0.0)                # matches the module
    total_loss = (jnp.float32(vote_weight) * mse
                  + jnp.float32(consistency_weight) * consistency_loss)
    return {
        "total_loss": total_loss,
        "mse_loss": mse,
        "consistency_loss": consistency_loss,
    }


def _reference_loss(predictions, targets, vote_counts,
                    vote_weight=1.0, consistency_weight=0.1):
    p = predictions.astype(jnp.float32)
    t = targets.astype(jnp.float32)
    mse = (p - t) ** 2
    if vote_counts is not None:
        vc = vote_counts.astype(jnp.float32)
        mse = mse * (vc / vc.max())[:, None]
    mse = mse.mean()
    return vote_weight * mse + consistency_weight * 0.0


if __name__ == "__main__":
    key = jax.random.PRNGKey(0)
    k1, k2, k3, k4, k5, k6, k7, k8 = jax.random.split(key, 8)

    # Galaxy Zoo has 37 vote-fraction outputs.
    N = 37

    # 1) Weighted, f32, single tile.
    B = 8
    predictions = jax.random.uniform(k1, (B, N), dtype=jnp.float32)
    targets = jax.random.uniform(k2, (B, N), dtype=jnp.float32)
    vote_counts = jax.random.uniform(k3, (B,), dtype=jnp.float32,
                                     minval=5.0, maxval=60.0)
    out = galaxy_zoo_loss(predictions, targets, vote_counts)
    jax.block_until_ready(out["total_loss"])
    ref = _reference_loss(predictions, targets, vote_counts)
    assert jnp.allclose(out["total_loss"], ref, atol=1e-5, rtol=1e-5), (
        out["total_loss"], ref)

    # 2) Unweighted (vote_counts=None).
    out2 = galaxy_zoo_loss(predictions, targets, None)
    jax.block_until_ready(out2["total_loss"])
    ref2 = _reference_loss(predictions, targets, None)
    assert jnp.allclose(out2["total_loss"], ref2, atol=1e-5, rtol=1e-5), (
        out2["total_loss"], ref2)

    # 3) Multi-tile grid + explicit 2-way split + ragged tail (in-kernel mask,
    #    no jnp.pad of the inputs) + native-bf16 DMA path.
    B2 = 40
    p_bf = jax.random.uniform(k4, (B2, N), dtype=jnp.float32).astype(jnp.bfloat16)
    t_bf = jax.random.uniform(k5, (B2, N), dtype=jnp.float32).astype(jnp.bfloat16)
    vc2 = jax.random.uniform(k6, (B2,), dtype=jnp.float32, minval=1.0, maxval=50.0)
    out3 = galaxy_zoo_loss(p_bf, t_bf, vc2, block_rows=32, num_splits=2)
    jax.block_until_ready(out3["total_loss"])
    ref3 = _reference_loss(p_bf, t_bf, vc2)
    assert jnp.allclose(out3["total_loss"], ref3, atol=1e-4, rtol=1e-4), (
        out3["total_loss"], ref3)

    # 4) Batch smaller than the bf16 packed tile (tiny zero-pad path).
    B3 = 12
    p_s = jax.random.uniform(k7, (B3, N), dtype=jnp.float32).astype(jnp.bfloat16)
    t_s = jax.random.uniform(k8, (B3, N), dtype=jnp.float32).astype(jnp.bfloat16)
    vc3 = jnp.linspace(1.0, 30.0, B3, dtype=jnp.float32)
    out4 = galaxy_zoo_loss(p_s, t_s, vc3)
    jax.block_until_ready(out4["total_loss"])
    ref4 = _reference_loss(p_s, t_s, vc3)
    assert jnp.allclose(out4["total_loss"], ref4, atol=1e-4, rtol=1e-4), (
        out4["total_loss"], ref4)

    print("KERNEL_OK")
</pallas_src>

<mosaic_0001>
module attributes {stable_mosaic.version = 11 : i64} {
  func.func @_galaxy_zoo_mse_kernel(%arg0: i32, %arg1: i32, %arg2: memref<8x37xf32, #tpu.memory_space<vmem>>, %arg3: memref<8x37xf32, #tpu.memory_space<vmem>>, %arg4: memref<1x1x8xf32, #tpu.memory_space<vmem>>, %arg5: memref<8x128xf32, #tpu.memory_space<vmem>>, %arg6: memref<1x37xf32, #tpu.memory_space<vmem>>) attributes {dimension_semantics = [#tpu.dimension_semantics<parallel>, #tpu.dimension_semantics<arbitrary>], iteration_bounds = array<i64: 1, 1>, scalar_prefetch = 0 : i64, scratch_operands = 1 : i64, tpu.core_type = #tpu.core_type<tc>, window_params = [{transform_indices = @transform_0, window_bounds = array<i64: 8, 37>}, {transform_indices = @transform_1, window_bounds = array<i64: 8, 37>}, {transform_indices = @transform_2, window_bounds = array<i64: 1, 1, 8>}, {transform_indices = @transform_3, window_bounds = array<i64: 8, 128>}]} {
    %c0_i32 = arith.constant 0 : i32
    %0 = arith.cmpi eq, %arg1, %c0_i32 : i32
    %1 = arith.extui %0 : i1 to i32
    %c0_i32_0 = arith.constant 0 : i32
    %2 = arith.cmpi ne, %1, %c0_i32_0 : i32
    scf.if %2 {
      %cst_13 = arith.constant 0.000000e+00 : f32
      %16 = vector.broadcast %cst_13 : f32 to vector<1x37xf32>
      %c0_14 = arith.constant 0 : index
      %c0_15 = arith.constant 0 : index
      %17 = vector.load %arg6[%c0_14, %c0_15] : memref<1x37xf32, #tpu.memory_space<vmem>>, vector<1x37xf32>
      tpu.vector_store %arg6[%c0_14, %c0_15], %16 {strides = array<i32>} : memref<1x37xf32, #tpu.memory_space<vmem>>, vector<1x37xf32>,
    } else {
    }
    %c0 = arith.constant 0 : index
    %c0_1 = arith.constant 0 : index
    %3 = vector.load %arg2[%c0, %c0_1] : memref<8x37xf32, #tpu.memory_space<vmem>>, vector<8x37xf32>
    %c0_2 = arith.constant 0 : index
    %c0_3 = arith.constant 0 : index
    %4 = vector.load %arg3[%c0_2, %c0_3] : memref<8x37xf32, #tpu.memory_space<vmem>>, vector<8x37xf32>
    %5 = arith.subf %3, %4 : vector<8x37xf32>
    %6 = arith.mulf %5, %5 : vector<8x37xf32>
    %c0_4 = arith.constant 0 : index
    %c0_5 = arith.constant 0 : index
    %c0_6 = arith.constant 0 : index
    %7 = vector.load %arg4[%c0_4, %c0_5, %c0_6] : memref<1x1x8xf32, #tpu.memory_space<vmem>>, vector<1x1x8xf32>
    %8 = vector.shape_cast %7 : vector<1x1x8xf32> to vector<1x8xf32>
    %c0_7 = arith.constant 0 : index
    %c0_8 = arith.constant 0 : index
    %9 = vector.load %arg6[%c0_7, %c0_8] : memref<1x37xf32, #tpu.memory_space<vmem>>, vector<1x37xf32>
    %cst = arith.constant dense<0.000000e+00> : vector<1x37xf32>
    %10 = tpu.matmul %8, %6, %cst {dimension_numbers = #tpu.dot_dimension_numbers<[1], [0], [0], [1], [0, 0, 1, 1], [], []>} : vector<1x8xf32>, vector<8x37xf32>, vector<1x37xf32> -> vector<1x37xf32>
    %11 = arith.addf %9, %10 : vector<1x37xf32>
    %c0_9 = arith.constant 0 : index
    %c0_10 = arith.constant 0 : index
    %12 = vector.load %arg6[%c0_9, %c0_10] : memref<1x37xf32, #tpu.memory_space<vmem>>, vector<1x37xf32>
    tpu.vector_store %arg6[%c0_9, %c0_10], %11 {strides = array<i32>} : memref<1x37xf32, #tpu.memory_space<vmem>>, vector<1x37xf32>,
    %c0_i32_11 = arith.constant 0 : i32
    %13 = arith.cmpi eq, %arg1, %c0_i32_11 : i32
    %14 = arith.extui %13 : i1 to i32
    %c0_i32_12 = arith.constant 0 : i32
    %15 = arith.cmpi ne, %14, %c0_i32_12 : i32
    scf.if %15 {
      %c0_13 = arith.constant 0 : index
      %c0_14 = arith.constant 0 : index
      %16 = vector.load %arg6[%c0_13, %c0_14] : memref<1x37xf32, #tpu.memory_space<vmem>>, vector<1x37xf32>
      %17 = vector.shape_cast %16 : vector<1x37xf32> to vector<1x1x37xf32>
      %cst_15 = arith.constant dense<0.000000e+00> : vector<1xf32>
      %18 = vector.multi_reduction <add>, %17, %cst_15 [1, 2] : vector<1x1x37xf32> to vector<1xf32>
      %19 = vector.shape_cast %18 : vector<1xf32> to vector<1x1x1xf32>
      %20 = vector.extract %19[0, 0, 0] : f32 from vector<1x1x1xf32>
      %21 = vector.broadcast %20 : f32 to vector<8x128xf32>
      %c0_16 = arith.constant 0 : index
      %c0_17 = arith.constant 0 : index
      %22 = vector.load %arg5[%c0_16, %c0_17] : memref<8x128xf32, #tpu.memory_space<vmem>>, vector<8x128xf32>
      tpu.vector_store %arg5[%c0_16, %c0_17], %21 {strides = array<i32>} : memref<8x128xf32, #tpu.memory_space<vmem>>, vector<8x128xf32>,
    } else {
    }
    return
  }
  func.func @transform_0(%arg0: i32, %arg1: i32) -> (i32, i32) {
    %c1_i32 = arith.constant 1 : i32
    %0 = arith.muli %arg0, %c1_i32 : i32
    %1 = arith.addi %0, %arg1 : i32
    %c0_i32 = arith.constant 0 : i32
    %c0_i32_0 = arith.constant 0 : i32
    return %1, %c0_i32 : i32, i32
  }
  func.func @transform_1(%arg0: i32, %arg1: i32) -> (i32, i32) {
    %c1_i32 = arith.constant 1 : i32
    %0 = arith.muli %arg0, %c1_i32 : i32
    %1 = arith.addi %0, %arg1 : i32
    %c0_i32 = arith.constant 0 : i32
    %c0_i32_0 = arith.constant 0 : i32
    return %1, %c0_i32 : i32, i32
  }
  func.func @transform_2(%arg0: i32, %arg1: i32) -> (i32, i32, i32) {
    %c1_i32 = arith.constant 1 : i32
    %0 = arith.muli %arg0, %c1_i32 : i32
    %1 = arith.addi %0, %arg1 : i32
    %c0_i32 = arith.constant 0 : i32
    %c0_i32_0 = arith.constant 0 : i32
    %c0_i32_1 = arith.constant 0 : i32
    return %1, %c0_i32, %c0_i32_0 : i32, i32, i32
  }
  func.func @transform_3(%arg0: i32, %arg1: i32) -> (i32, i32) {
    %c0_i32 = arith.constant 0 : i32
    %c0_i32_0 = arith.constant 0 : i32
    return %arg0, %c0_i32 : i32, i32
  }
}

</mosaic_0001>

<bundles_post_ra>
// kernel: tpu_custom_call.1
= control target key start
LH: loop header
LB: loop body
LE: loop exit
PB: predicated region body
PF: predicated region fallthrough
CT: control target
= control target key end

     0   :  { %8 = vsyncpa [#allocation4], 0  ;;  %s265_s0 = inlined_call_operand.hbm [shape: f32[8,37], index: 0, kind: input, shape index: {}]   ;;  %s266_s1 = inlined_call_operand.hbm [shape: f32[8,37], index: 1, kind: input, shape index: {}]   ;;  %s267_s2 = inlined_call_operand.vmem [shape: f32[1,1,8], index: 2, kind: input, shape index: {}]   ;;  %s268_s3 = inlined_call_operand.hbm [shape: f32[8,128], index: 3, kind: output, shape index: {}]  }
   0x1   :  { %9 = vsyncpa [#allocation7], 0 }
   0x2   :  { %10 = vsyncpa [#allocation5], 0  ;;  %s19_s14 = sshll.u32 %s265_s0, 4  ;;  %s226_s15 = smov [#allocation3]   ;;  %s20_s14 = int_to_ptr.hbm [resolvable:$true] %s19_s14 }
   0x3   :  { %s21_s16 = sshll.u32 %s226_s15, 4  ;;  %s33_s19 = sshll.u32 %s266_s1, 4  ;;  %s22_s16 = int_to_ptr.vmem [resolvable:$true] %s21_s16  ;;  %s34_s19 = int_to_ptr.hbm [resolvable:$true] %s33_s19 }
   0x4   :  { %24 = dma.hbm_to_vmem [thread:$0]  %s20_s14, 128, %s22_s16, [#allocation4]  }
   0x5   :  { %s227_s20 = smov [#allocation6]  }
   0x6   :  { %s35_s21 = sshll.u32 %s227_s20, 4  ;;  %s36_s21 = int_to_ptr.vmem [resolvable:$true] %s35_s21 }
   0x7   :  { %38 = dma.hbm_to_vmem [thread:$0]  %s34_s19, 128, %s36_s21, [#allocation7]  }
   0x8   :  { %220 = dma.done.wait [#allocation4], 128  }
   0x9   :  { %221 = vsyncadd [#allocation4], 4294967168 }
   0xa   :  { %222 = dma.done.wait [#allocation7], 128  }
   0xb   :  { %223 = vsyncadd [#allocation7], 4294967168  ;;  %vm69_vm0 = vcmask 294912   ;;  %v228_v0 = vmov 0.0   ;;  %v71_v1 = vld [vmem:[#allocation3] sm:$0xff]  ;;  %v72_v2 = vld [vmem:[#allocation6] sm:$0xff] }
   0xc   :  { %70 = vst.msk [vmem:[#allocation2] sm:$0x1] %vm69_vm0, %v228_v0  ;;  %v73_v3 = vsub.f32 %v71_v1, %v72_v2  ;;  %v75_v5 = vld [vmem:[%s267_s2] sm:$0x1]  ;;  %vm77_vm1 = vcmask 64512   ;;  %s229_s2 = smov [#allocation8]  }
   0xd   :  { %s125_s22 = sshll.u32 %s229_s2, 4  ;;  %s127_s25 = sshll.u32 %s268_s3, 4  ;;  %s126_s22 = int_to_ptr.vmem [resolvable:$true] %s125_s22  ;;  %s128_s25 = int_to_ptr.hbm [resolvable:$true] %s127_s25 }
   0xe   :  { %v74_v4 = vmul.f32 %v73_v3, %v73_v3 }
  0x10   :  { %96 = vmatpush.msra.mxu0 %v74_v4 }
  0x11   :  { %141 = vmatmul.msk.f32.vlgmr.msra.gmra.mxu0 %vm77_vm1, %v75_v5 }
  0x13   :  { %v76_v6 = vld [vmem:[#allocation2] sm:$0x1] }
  0x8e   :  { %v98_v7 = vpop.f32.mrf.mxu0 }
  0x8f   :  { %v101_v8 = vadd.f32 %v98_v7, %v76_v6 }
  0x91   :  { %103 = vst.msk [vmem:[#allocation2] sm:$0x1] %vm69_vm0, %v101_v8 }
  0x98   :  { %v107_v9 = vld [vmem:[#allocation2] sm:$0x1] }
  0x99   :  { %v108_v10 = vsel %vm69_vm0, %v107_v9, 0.0 }
  0x9a   :  { %109 = vadd.xlane.f32.xlu0 %v108_v10 }
 0x10d   :  { %v110_v11 = vpop.xlane.xlu0 %109 }
 0x10e   :  { %v111_v12 = vrot.slane %v110_v11, 4 }
 0x110   :  { %v112_v13 = vadd.f32 %v111_v12, %v110_v11 }
 0x112   :  { %v113_v14 = vrot.slane %v112_v13, 2 }
 0x114   :  { %v114_v15 = vadd.f32 %v113_v14, %v112_v13 }
 0x116   :  { %v115_v16 = vrot.slane %v114_v15, 1 }
 0x118   :  { %v116_v17 = vadd.f32 %v115_v16, %v114_v15 }
 0x11a   :  { %142 = vpush %v116_v17 }
 0x14b   :  { %s143_s26 = spop %142 }
 0x14c   :  { %v118_v18 = vstv %s143_s26 }
 0x14d   :  { %119 = vst [vmem:[#allocation8] sm:$0xff] %v118_v18 }
 0x14e   :  { %130 = dma.vmem_to_hbm [thread:$0]  %s126_s22, 128, %s128_s25, [#allocation5]  }
 0x14f   :  { %224 = dma.done.wait [#allocation5], 128  }
 0x150   :  { %225 = vsyncadd [#allocation5], 4294967168 }
 0x151   :  { %135 = vsyncpa [#allocation4], 1 }
 0x152   :  { %136 = vsyncpa [#allocation7], 1 }
 0x153   :  { %137 = vsyncpa [#allocation5], 1 }

</bundles_post_ra>
